<compile_context>
chip_gen: v7x
topology: tpu7x:2x2x1
jax: 0.10.0
libtpu: 0.0.40
codegen_flags: <defaults>
</compile_context>

<pallas_src>
import jax
import jax.numpy as jnp
from jax.experimental import pallas as pl
from jax.experimental.pallas import tpu as pltpu

_MIB = 1024 * 1024


# ----------------------------------------------------------------------------
# Kernel body
# ----------------------------------------------------------------------------
def _coupling_kernel(sign_ref, x_ref, w1_ref, b1_ref, w2_ref, b2_ref, y_ref):
    """y = x + sign * (relu(x @ W1_full + b1) @ W2_full + b2_full)."""
    x = x_ref[...]                                            # (TB, D) f32
    # hidden = relu(x @ W1_full + b1)   -- bf16 MXU matmul, f32 accumulate
    h = jnp.dot(x.astype(jnp.bfloat16), w1_ref[...],
                preferred_element_type=jnp.float32)           # (TB, H) f32
    h = jnp.maximum(h + b1_ref[...], 0.0)
    # t = h @ W2_full + b2_full (exactly zero at pass-through columns)
    t = jnp.dot(h.astype(jnp.bfloat16), w2_ref[...],
                preferred_element_type=jnp.float32)           # (TB, D) f32
    t = t + b2_ref[...]
    y_ref[...] = x + sign_ref[0] * t                          # sign: SMEM scalar


# ----------------------------------------------------------------------------
# Tiling / VMEM sizing
# ----------------------------------------------------------------------------
def _vmem_budget_and_limit():
    """(tile-sizing budget bytes, explicit vmem_limit_bytes or None) per gen."""
    try:
        phys = int(pltpu.get_tpu_info().vmem_capacity_bytes)
    except Exception:
        phys = None
    if not phys:
        return 12 * _MIB, None                 # unknown chip: conservative
    if phys >= 100 * _MIB:                     # v5e / v6e: 128 MiB physical
        budget = 28 * _MIB
    else:                                      # v7x: 64 MiB physical
        budget = 40 * _MIB
    budget = min(budget, phys // 2)
    limit = max(budget, min(budget + 8 * _MIB, phys - 8 * _MIB))
    return budget, limit


def _round_up(v, m):
    return -(-v // m) * m


def _pick_block_b(B, D, H, want, budget):
    """Largest batch tile that (a) fits the VMEM budget and (b) keeps >= 2
    grid blocks when B allows (so 'parallel' shards across v7x's 2 TCs)."""
    if B <= 8:
        return B                               # full-extent block, always legal

    def est(t):
        return (2 * 2 * t * D * 4              # x, y tiles, double-buffered f32
                + t * D * 2 + t * H * 2        # bf16 cast temporaries
                + t * H * 4                    # f32 hidden activation
                + 2 * D * H * 2                # bf16 weights (single-buffered)
                + (H + 2 * D) * 4)             # f32 biases

    cap = min(want, _round_up(B, 8))
    if B >= 16:
        cap = min(cap, _round_up(pl.cdiv(B, 2), 8))    # keep n_blocks >= 2
    tb = max(8, (cap // 8) * 8)
    if tb >= 128:                              # step down in 128-row increments
        tb = max(128, (tb // 128) * 128)
        while tb > 128 and est(tb) > budget:
            tb -= 128
    while tb > 8 and est(tb) > budget:         # fine-grained fallback
        tb -= 8
    return tb


# ----------------------------------------------------------------------------
# pallas_call construction
# ----------------------------------------------------------------------------
_WEIGHTS_SINGLE_BUFFERED = True   # flips off if this jax rejects pipeline_mode


def _build_coupling_call(B, D, H, tb, vmem_limit, single_buffer):
    n_blocks = pl.cdiv(B, tb)

    def const_spec(shape):
        idx = lambda i: (0, 0)
        if single_buffer:
            # Grid-invariant operand: one VMEM buffer is enough.
            return pl.BlockSpec(shape, idx, pipeline_mode=pl.Buffered(1))
        return pl.BlockSpec(shape, idx)

    cp_kwargs = dict(dimension_semantics=("parallel",))
    if vmem_limit is not None:
        cp_kwargs["vmem_limit_bytes"] = int(vmem_limit)

    flops = 4 * B * D * H                      # two (B,D)x(D,H)-class matmuls
    bytes_accessed = 2 * B * D * 4 + 2 * D * H * 2 + (H + 2 * D) * 4

    return pl.pallas_call(
        _coupling_kernel,
        out_shape=jax.ShapeDtypeStruct((B, D), jnp.float32),
        grid=(n_blocks,),
        in_specs=[
            pl.BlockSpec(memory_space=pltpu.MemorySpace.SMEM),   # sign (1,)
            pl.BlockSpec((tb, D), lambda i: (i, 0)),             # x tile
            const_spec((D, H)),                                  # W1_full
            const_spec((1, H)),                                  # b1
            const_spec((H, D)),                                  # W2_full
            const_spec((1, D)),                                  # b2_full
        ],
        out_specs=pl.BlockSpec((tb, D), lambda i: (i, 0)),
        compiler_params=pltpu.CompilerParams(**cp_kwargs),
        cost_estimate=pl.CostEstimate(
            flops=flops, transcendentals=0, bytes_accessed=bytes_accessed),
    )


def _additive_coupling_fwd(x, sign, w1_full, b1, w2_full, b2_full, *, block_b):
    global _WEIGHTS_SINGLE_BUFFERED
    B, D = x.shape
    H = w1_full.shape[1]
    budget, vmem_limit = _vmem_budget_and_limit()
    tb = _pick_block_b(B, D, H, block_b, budget)

    modes = (True, False) if _WEIGHTS_SINGLE_BUFFERED else (False,)
    last_err = None
    for single in modes:
        try:
            call = _build_coupling_call(B, D, H, tb, vmem_limit, single)
            y = call(sign, x, w1_full, b1, w2_full, b2_full)
            _WEIGHTS_SINGLE_BUFFERED = single
            return y
        except Exception as e:                 # version fallback (Buffered(1))
            last_err = e
    raise last_err


# ----------------------------------------------------------------------------
# Module wrapper
# ----------------------------------------------------------------------------
class AdditiveCoupling:
    """JAX/Pallas re-implementation of the PyTorch AdditiveCoupling module.

    The `nonlinearity` submodule is realized as a 2-layer MLP
    (half -> hidden -> half, ReLU) with deterministic weights.
    """

    def __init__(self, in_out_dim, mask_config, hidden_dim=64, seed=0,
                 block_b=512):
        assert in_out_dim % 2 == 0, "in_out_dim must be even for this kernel"
        self.in_out_dim = in_out_dim
        self.mask_config = mask_config
        self.block_b = block_b
        half = in_out_dim // 2

        # Deterministic init of the nonlinearity MLP (half -> hidden -> half).
        k1, k2, k3, k4 = jax.random.split(jax.random.PRNGKey(seed), 4)
        s1 = 1.0 / jnp.sqrt(half)
        s2 = 1.0 / jnp.sqrt(hidden_dim)
        self.w1 = jax.random.uniform(k1, (half, hidden_dim), jnp.float32, -1, 1) * s1
        self.b1 = jax.random.uniform(k2, (1, hidden_dim), jnp.float32, -1, 1) * s1
        self.w2 = jax.random.uniform(k3, (hidden_dim, half), jnp.float32, -1, 1) * s2
        self.b2 = jax.random.uniform(k4, (1, half), jnp.float32, -1, 1) * s2

        # Fold the even/odd gather/scatter into the weights (once, host-side).
        first_off = mask_config          # odd columns if mask_config==1 else even
        second_off = 1 - mask_config
        w1_full = jnp.zeros((in_out_dim, hidden_dim), jnp.float32)
        w1_full = w1_full.at[first_off::2, :].set(self.w1)
        w2_full = jnp.zeros((hidden_dim, in_out_dim), jnp.float32)
        w2_full = w2_full.at[:, second_off::2].set(self.w2)
        b2_full = jnp.zeros((1, in_out_dim), jnp.float32)
        b2_full = b2_full.at[:, second_off::2].set(self.b2)

        self.w1_full = w1_full.astype(jnp.bfloat16)   # MXU-native, half VMEM
        self.w2_full = w2_full.astype(jnp.bfloat16)
        self.b2_full = b2_full                        # f32 bias

    def __call__(self, x, log_det_J, reverse=False):
        sign = jnp.asarray([-1.0 if reverse else 1.0], dtype=jnp.float32)
        y = _additive_coupling_fwd(x, sign, self.w1_full, self.b1,
                                   self.w2_full, self.b2_full,
                                   block_b=self.block_b)
        return y, log_det_J   # additive coupling: log-det-Jacobian unchanged

    # Pure-JAX (f32) reference for verification.
    def reference(self, x, log_det_J, reverse=False):
        first_off = self.mask_config
        second_off = 1 - self.mask_config
        first = x[:, first_off::2]
        second = x[:, second_off::2]
        h = jnp.maximum(first @ self.w1 + self.b1, 0.0)
        t = h @ self.w2 + self.b2
        second_t = second - t if reverse else second + t
        y = jnp.zeros_like(x)
        y = y.at[:, first_off::2].set(first)
        y = y.at[:, second_off::2].set(second_t)
        return y, log_det_J


if __name__ == "__main__":
    configs = [
        dict(B=64, D=128, H=128),    # multi-block batch grid (grid=(2,))
        dict(B=72, D=128, H=128),    # B not a multiple of the tile -> boundary clip
        dict(B=8, D=32, H=64),       # tiny single full-extent block
    ]
    key = jax.random.PRNGKey(0)
    for cfg in configs:
        key, kx = jax.random.split(key)
        x = jax.random.normal(kx, (cfg["B"], cfg["D"]), dtype=jnp.float32)
        log_det_J = jnp.zeros((), dtype=jnp.float32)
        for mask_config in (0, 1):
            layer = AdditiveCoupling(cfg["D"], mask_config,
                                     hidden_dim=cfg["H"], seed=42)
            for reverse in (False, True):
                y, ld = layer(x, log_det_J, reverse=reverse)
                y = jax.block_until_ready(y)
                y_ref, _ = layer.reference(x, log_det_J, reverse=reverse)
                assert y.shape == x.shape
                # bf16 matmul operands with f32 accumulation -> loose tolerance
                assert jnp.allclose(y, y_ref, atol=3e-2, rtol=3e-2), (
                    f"mismatch cfg={cfg} mask_config={mask_config} "
                    f"reverse={reverse} "
                    f"max_err={float(jnp.max(jnp.abs(y - y_ref)))}")
                # pass-through ("first") columns must be bit-exact
                f_off = mask_config
                assert jnp.array_equal(y[:, f_off::2], x[:, f_off::2]), (
                    "pass-through columns were modified")
    print("KERNEL_OK")
</pallas_src>

<mosaic_0001>
module attributes {stable_mosaic.version = 11 : i64} {
  func.func @_coupling_kernel(%arg0: i32, %arg1: memref<1xf32, #tpu.memory_space<smem>>, %arg2: memref<32x128xf32, #tpu.memory_space<vmem>>, %arg3: memref<128x128xbf16, #tpu.memory_space<vmem>>, %arg4: memref<1x128xf32, #tpu.memory_space<vmem>>, %arg5: memref<128x128xbf16, #tpu.memory_space<vmem>>, %arg6: memref<1x128xf32, #tpu.memory_space<vmem>>, %arg7: memref<32x128xf32, #tpu.memory_space<vmem>>) attributes {dimension_semantics = [#tpu.dimension_semantics<parallel>], iteration_bounds = array<i64: 2>, scalar_prefetch = 0 : i64, scratch_operands = 0 : i64, tpu.core_type = #tpu.core_type<tc>, window_params = [{transform_indices = @transform_0, window_bounds = array<i64: 1>}, {transform_indices = @transform_1, window_bounds = array<i64: 32, 128>}, {pipeline_mode = #tpu.pipeline_mode<synchronous>, transform_indices = @transform_2, window_bounds = array<i64: 128, 128>}, {pipeline_mode = #tpu.pipeline_mode<synchronous>, transform_indices = @transform_3, window_bounds = array<i64: 1, 128>}, {pipeline_mode = #tpu.pipeline_mode<synchronous>, transform_indices = @transform_4, window_bounds = array<i64: 128, 128>}, {pipeline_mode = #tpu.pipeline_mode<synchronous>, transform_indices = @transform_5, window_bounds = array<i64: 1, 128>}, {transform_indices = @transform_6, window_bounds = array<i64: 32, 128>}]} {
    %c0 = arith.constant 0 : index
    %c0_0 = arith.constant 0 : index
    %0 = vector.load %arg2[%c0, %c0_0] : memref<32x128xf32, #tpu.memory_space<vmem>>, vector<32x128xf32>
    %1 = arith.truncf %0 : vector<32x128xf32> to vector<32x128xbf16>
    %c0_1 = arith.constant 0 : index
    %c0_2 = arith.constant 0 : index
    %2 = vector.load %arg3[%c0_1, %c0_2] : memref<128x128xbf16, #tpu.memory_space<vmem>>, vector<128x128xbf16>
    %cst = arith.constant dense<0.000000e+00> : vector<32x128xf32>
    %3 = tpu.matmul %1, %2, %cst {dimension_numbers = #tpu.dot_dimension_numbers<[1], [0], [0], [1], [0, 0, 1, 1], [], []>} : vector<32x128xbf16>, vector<128x128xbf16>, vector<32x128xf32> -> vector<32x128xf32>
    %c0_3 = arith.constant 0 : index
    %c0_4 = arith.constant 0 : index
    %4 = vector.load %arg4[%c0_3, %c0_4] : memref<1x128xf32, #tpu.memory_space<vmem>>, vector<1x128xf32>
    %5 = vector.broadcast %4 : vector<1x128xf32> to vector<32x128xf32>
    %6 = arith.addf %3, %5 : vector<32x128xf32>
    %cst_5 = arith.constant 0.000000e+00 : f32
    %7 = vector.broadcast %cst_5 : f32 to vector<32x128xf32>
    %8 = arith.maximumf %6, %7 : vector<32x128xf32>
    %9 = arith.truncf %8 : vector<32x128xf32> to vector<32x128xbf16>
    %c0_6 = arith.constant 0 : index
    %c0_7 = arith.constant 0 : index
    %10 = vector.load %arg5[%c0_6, %c0_7] : memref<128x128xbf16, #tpu.memory_space<vmem>>, vector<128x128xbf16>
    %cst_8 = arith.constant dense<0.000000e+00> : vector<32x128xf32>
    %11 = tpu.matmul %9, %10, %cst_8 {dimension_numbers = #tpu.dot_dimension_numbers<[1], [0], [0], [1], [0, 0, 1, 1], [], []>} : vector<32x128xbf16>, vector<128x128xbf16>, vector<32x128xf32> -> vector<32x128xf32>
    %c0_9 = arith.constant 0 : index
    %c0_10 = arith.constant 0 : index
    %12 = vector.load %arg6[%c0_9, %c0_10] : memref<1x128xf32, #tpu.memory_space<vmem>>, vector<1x128xf32>
    %13 = vector.broadcast %12 : vector<1x128xf32> to vector<32x128xf32>
    %14 = arith.addf %11, %13 : vector<32x128xf32>
    %c0_11 = arith.constant 0 : index
    %15 = memref.load %arg1[%c0_11] : memref<1xf32, #tpu.memory_space<smem>>
    %16 = vector.broadcast %15 : f32 to vector<32x128xf32>
    %17 = arith.mulf %16, %14 : vector<32x128xf32>
    %18 = arith.addf %0, %17 : vector<32x128xf32>
    %c0_12 = arith.constant 0 : index
    %c0_13 = arith.constant 0 : index
    %19 = vector.load %arg7[%c0_12, %c0_13] : memref<32x128xf32, #tpu.memory_space<vmem>>, vector<32x128xf32>
    tpu.vector_store %arg7[%c0_12, %c0_13], %18 {strides = array<i32>} : memref<32x128xf32, #tpu.memory_space<vmem>>, vector<32x128xf32>,
    return
  }
  func.func @transform_0(%arg0: i32) -> i32 {
    %c0_i32 = arith.constant 0 : i32
    %c0_i32_0 = arith.constant 0 : i32
    return %c0_i32 : i32
  }
  func.func @transform_1(%arg0: i32) -> (i32, i32) {
    %c0_i32 = arith.constant 0 : i32
    %c0_i32_0 = arith.constant 0 : i32
    return %arg0, %c0_i32 : i32, i32
  }
  func.func @transform_2(%arg0: i32) -> (i32, i32) {
    %c0_i32 = arith.constant 0 : i32
    %c0_i32_0 = arith.constant 0 : i32
    %c0_i32_1 = arith.constant 0 : i32
    return %c0_i32, %c0_i32_0 : i32, i32
  }
  func.func @transform_3(%arg0: i32) -> (i32, i32) {
    %c0_i32 = arith.constant 0 : i32
    %c0_i32_0 = arith.constant 0 : i32
    %c0_i32_1 = arith.constant 0 : i32
    return %c0_i32, %c0_i32_0 : i32, i32
  }
  func.func @transform_4(%arg0: i32) -> (i32, i32) {
    %c0_i32 = arith.constant 0 : i32
    %c0_i32_0 = arith.constant 0 : i32
    %c0_i32_1 = arith.constant 0 : i32
    return %c0_i32, %c0_i32_0 : i32, i32
  }
  func.func @transform_5(%arg0: i32) -> (i32, i32) {
    %c0_i32 = arith.constant 0 : i32
    %c0_i32_0 = arith.constant 0 : i32
    %c0_i32_1 = arith.constant 0 : i32
    return %c0_i32, %c0_i32_0 : i32, i32
  }
  func.func @transform_6(%arg0: i32) -> (i32, i32) {
    %c0_i32 = arith.constant 0 : i32
    %c0_i32_0 = arith.constant 0 : i32
    return %arg0, %c0_i32 : i32, i32
  }
}

module attributes {stable_mosaic.version = 11 : i64} {
  func.func @_coupling_kernel(%arg0: i32, %arg1: memref<1xf32, #tpu.memory_space<smem>>, %arg2: memref<32x128xf32, #tpu.memory_space<vmem>>, %arg3: memref<128x128xbf16, #tpu.memory_space<vmem>>, %arg4: memref<1x128xf32, #tpu.memory_space<vmem>>, %arg5: memref<128x128xbf16, #tpu.memory_space<vmem>>, %arg6: memref<1x128xf32, #tpu.memory_space<vmem>>, %arg7: memref<32x128xf32, #tpu.memory_space<vmem>>) attributes {dimension_semantics = [#tpu.dimension_semantics<parallel>], iteration_bounds = array<i64: 2>, scalar_prefetch = 0 : i64, scratch_operands = 0 : i64, tpu.core_type = #tpu.core_type<tc>, window_params = [{transform_indices = @transform_0, window_bounds = array<i64: 1>}, {transform_indices = @transform_1, window_bounds = array<i64: 32, 128>}, {pipeline_mode = #tpu.pipeline_mode<synchronous>, transform_indices = @transform_2, window_bounds = array<i64: 128, 128>}, {pipeline_mode = #tpu.pipeline_mode<synchronous>, transform_indices = @transform_3, window_bounds = array<i64: 1, 128>}, {pipeline_mode = #tpu.pipeline_mode<synchronous>, transform_indices = @transform_4, window_bounds = array<i64: 128, 128>}, {pipeline_mode = #tpu.pipeline_mode<synchronous>, transform_indices = @transform_5, window_bounds = array<i64: 1, 128>}, {transform_indices = @transform_6, window_bounds = array<i64: 32, 128>}]} {
    %c0 = arith.constant 0 : index
    %c0_0 = arith.constant 0 : index
    %0 = vector.load %arg2[%c0, %c0_0] : memref<32x128xf32, #tpu.memory_space<vmem>>, vector<32x128xf32>
    %1 = arith.truncf %0 : vector<32x128xf32> to vector<32x128xbf16>
    %c0_1 = arith.constant 0 : index
    %c0_2 = arith.constant 0 : index
    %2 = vector.load %arg3[%c0_1, %c0_2] : memref<128x128xbf16, #tpu.memory_space<vmem>>, vector<128x128xbf16>
    %cst = arith.constant dense<0.000000e+00> : vector<32x128xf32>
    %3 = tpu.matmul %1, %2, %cst {dimension_numbers = #tpu.dot_dimension_numbers<[1], [0], [0], [1], [0, 0, 1, 1], [], []>} : vector<32x128xbf16>, vector<128x128xbf16>, vector<32x128xf32> -> vector<32x128xf32>
    %c0_3 = arith.constant 0 : index
    %c0_4 = arith.constant 0 : index
    %4 = vector.load %arg4[%c0_3, %c0_4] : memref<1x128xf32, #tpu.memory_space<vmem>>, vector<1x128xf32>
    %5 = vector.broadcast %4 : vector<1x128xf32> to vector<32x128xf32>
    %6 = arith.addf %3, %5 : vector<32x128xf32>
    %cst_5 = arith.constant 0.000000e+00 : f32
    %7 = vector.broadcast %cst_5 : f32 to vector<32x128xf32>
    %8 = arith.maximumf %6, %7 : vector<32x128xf32>
    %9 = arith.truncf %8 : vector<32x128xf32> to vector<32x128xbf16>
    %c0_6 = arith.constant 0 : index
    %c0_7 = arith.constant 0 : index
    %10 = vector.load %arg5[%c0_6, %c0_7] : memref<128x128xbf16, #tpu.memory_space<vmem>>, vector<128x128xbf16>
    %cst_8 = arith.constant dense<0.000000e+00> : vector<32x128xf32>
    %11 = tpu.matmul %9, %10, %cst_8 {dimension_numbers = #tpu.dot_dimension_numbers<[1], [0], [0], [1], [0, 0, 1, 1], [], []>} : vector<32x128xbf16>, vector<128x128xbf16>, vector<32x128xf32> -> vector<32x128xf32>
    %c0_9 = arith.constant 0 : index
    %c0_10 = arith.constant 0 : index
    %12 = vector.load %arg6[%c0_9, %c0_10] : memref<1x128xf32, #tpu.memory_space<vmem>>, vector<1x128xf32>
    %13 = vector.broadcast %12 : vector<1x128xf32> to vector<32x128xf32>
    %14 = arith.addf %11, %13 : vector<32x128xf32>
    %c0_11 = arith.constant 0 : index
    %15 = memref.load %arg1[%c0_11] : memref<1xf32, #tpu.memory_space<smem>>
    %16 = vector.broadcast %15 : f32 to vector<32x128xf32>
    %17 = arith.mulf %16, %14 : vector<32x128xf32>
    %18 = arith.addf %0, %17 : vector<32x128xf32>
    %c0_12 = arith.constant 0 : index
    %c0_13 = arith.constant 0 : index
    %19 = vector.load %arg7[%c0_12, %c0_13] : memref<32x128xf32, #tpu.memory_space<vmem>>, vector<32x128xf32>
    tpu.vector_store %arg7[%c0_12, %c0_13], %18 {strides = array<i32>} : memref<32x128xf32, #tpu.memory_space<vmem>>, vector<32x128xf32>,
    return
  }
  func.func @transform_0(%arg0: i32) -> i32 {
    %c0_i32 = arith.constant 0 : i32
    %c0_i32_0 = arith.constant 0 : i32
    return %c0_i32 : i32
  }
  func.func @transform_1(%arg0: i32) -> (i32, i32) {
    %c0_i32 = arith.constant 0 : i32
    %c0_i32_0 = arith.constant 0 : i32
    return %arg0, %c0_i32 : i32, i32
  }
  func.func @transform_2(%arg0: i32) -> (i32, i32) {
    %c0_i32 = arith.constant 0 : i32
    %c0_i32_0 = arith.constant 0 : i32
    %c0_i32_1 = arith.constant 0 : i32
    return %c0_i32, %c0_i32_0 : i32, i32
  }
  func.func @transform_3(%arg0: i32) -> (i32, i32) {
    %c0_i32 = arith.constant 0 : i32
    %c0_i32_0 = arith.constant 0 : i32
    %c0_i32_1 = arith.constant 0 : i32
    return %c0_i32, %c0_i32_0 : i32, i32
  }
  func.func @transform_4(%arg0: i32) -> (i32, i32) {
    %c0_i32 = arith.constant 0 : i32
    %c0_i32_0 = arith.constant 0 : i32
    %c0_i32_1 = arith.constant 0 : i32
    return %c0_i32, %c0_i32_0 : i32, i32
  }
  func.func @transform_5(%arg0: i32) -> (i32, i32) {
    %c0_i32 = arith.constant 0 : i32
    %c0_i32_0 = arith.constant 0 : i32
    %c0_i32_1 = arith.constant 0 : i32
    return %c0_i32, %c0_i32_0 : i32, i32
  }
  func.func @transform_6(%arg0: i32) -> (i32, i32) {
    %c0_i32 = arith.constant 0 : i32
    %c0_i32_0 = arith.constant 0 : i32
    return %arg0, %c0_i32 : i32, i32
  }
}

</mosaic_0001>

<bundles_post_ra>
// kernel: tpu_custom_call.1
= control target key start
LH: loop header
LB: loop body
LE: loop exit
PB: predicated region body
PF: predicated region fallthrough
CT: control target
= control target key end

     0   :  { %s1326_s0 = inlined_call_operand.<no memory space> [shape: f32[1], index: 0, kind: input, shape index: {}]   ;;  %s1327_s1 = inlined_call_operand.hbm [shape: f32[64,128], index: 1, kind: input, shape index: {}]   ;;  %s1328_s2 = inlined_call_operand.hbm [shape: bf16[128,128], index: 2, kind: input, shape index: {}]   ;;  %s1329_s3 = inlined_call_operand.vmem [shape: f32[1,128], index: 3, kind: input, shape index: {}]   ;;  %s1330_s4 = inlined_call_operand.hbm [shape: bf16[128,128], index: 4, kind: input, shape index: {}]   ;;  %s1331_s5 = inlined_call_operand.vmem [shape: f32[1,128], index: 5, kind: input, shape index: {}]   ;;  %s1332_s6 = inlined_call_operand.hbm [shape: f32[64,128], index: 6, kind: output, shape index: {}]  }
   0x1   :  { %11 = sst [smem:[#allocation2]] %s1326_s0 }
   0x2   :  { %12 = vsyncpa [#allocation4], 0 }
   0x3   :  { %14 = vsyncpa [#allocation4 + $0x1], 0 }
   0x4   :  { %15 = vsyncpa [#allocation7], 0 }
   0x5   :  { %16 = vsyncpa [#allocation5], 0 }
   0x6   :  { %18 = vsyncpa [#allocation5 + $0x1], 0  ;;  %s1068_s23 = smov 0   ;;  %s1070_s24 = smov 0  }
   0x7   :  { %s1072_s25 = smov 0   ;;  %s1074_s26 = smov 0  }
   0x8 LB: > { %s1089_s0 = sadd.s32 4294967295, %s1018_s26   ;;  %s675_s27 = sadd.s32 4294967294, %s1018_s26   ;;  %s1018_s26 = sphi %s1074_s26, %s1352_s26   ;;  %s1014_s25 = sphi %s1072_s25, %s1351_s25   ;;  %s1010_s24 = sphi %s1070_s24, %s1350_s24   ;;  %s1006_s23 = sphi %s1068_s23, %s1349_s23  }
   0x9   : > { %p65_p0 = scmp.ne.s32.totalorder %s1010_s24, %s1006_s23  ;;  %p1333_p1 = scmp.eq.s32.totalorder %s1089_s0, 0 }
   0xa   : > { %p179_p3 = scmp.eq.s32.totalorder %s675_s27, 1  ;;  %p676_p5 = scmp.ge.s32.totalorder %s1018_s26, 1 }
   0xb   : > { %p1098_p4 = por %p1333_p1, %p65_p0  ;;  %p186_p7 = scmp.lt.s32.totalorder %s1018_s26, 3 }
   0xc   : > { %p1103_p6 = por %p179_p3, %p65_p0  ;;  %s1020_s7 = smov [#allocation6]  }
   0xd   : > { %s1336_s28 = scalar_select %p1098_p4, 1, 0 }
   0xe   : > { %s1337_s29 = scalar_select %p1103_p6, 1, 0 }
   0xf   : > { %p1108_p8 = pnand %p676_p5, %p186_p7  ;;  %s201_s8 = sshll.u32 %s1020_s7, 4  ;;  %s1112_s8 = int_to_ptr.vmem [resolvable:$true] %s201_s8 }
  0x10   : > { %s1021_s10 = smov [#allocation8]   ;;  %s862_s14 = scalar_lea.hbm %s1328_s2, 1024 }
  0x11   : > { %p785_p9 = pneg %p1108_p8  ;;  %s217_s11 = sshll.u32 %s1021_s10, 4  ;;  %s1123_s11 = int_to_ptr.vmem [resolvable:$true] %s217_s11 }
  0x12   : > { %p863_p12 = scmp.ne.s32.totalorder %s1328_s2, %s862_s14  ;;  %p869_p5 = scmp.lt.u32.totalorder %s862_s14, %s1328_s2 }
  0x13   : > { %p1119_p11 = pnand %p785_p9, %p1333_p1 }
  0x15   : > { %p864_p13 = pneg %p1119_p11 }
  0x17   : > { %p865_p0 = pnand %p864_p13, %p863_p12 }
  0x19   : > { %p866_p3 = pneg %p865_p0 }
  0x1b   : > { %p871_p7 = pnand %p869_p5, %p866_p3 }
  0x1d   : > { %874 = shalt.err (!%p871_p7)
}
  0x1e   : > { %s875_s19 = scalar_lea.vmem %s1112_s8, 1024  ;;  %p883_p2 = scmp.lt.s32.totalorder %s1112_s8, %s1112_s8 }
  0x1f   : > { %p876_p9 = scmp.ne.s32.totalorder %s1112_s8, %s875_s19  ;;  %p884_p12 = scmp.lt.s32.totalorder %s875_s19, %s875_s19 }
  0x21   : > { %p878_p10 = pnand %p876_p9, %p864_p13  ;;  %p885_p0 = por %p884_p12, %p883_p2 }
  0x23   : > { %p879_p1 = pneg %p878_p10 }
  0x25   : > { %p886_p6 = pnand %p885_p0, %p879_p1 }
  0x27   : > { %889 = shalt.err (!%p886_p6)
}
  0x28   : > { %s1022_s20 = smov 64   ;;  %s1023_s21 = smov 4  }
  0x29   : > { %788 = dma.hbm_to_vmem [thread:$0]  (!%p1119_p11), %s1328_s2, 1024, %s1112_s8, [#allocation7], %s1022_s20, %s1022_s20, %s1023_s21  }
  0x2a   : > { %s890_s12 = scalar_lea.hbm %s1330_s4, 1024 }
  0x2b   : > { %p891_p2 = scmp.ne.s32.totalorder %s1330_s4, %s890_s12  ;;  %p897_p10 = scmp.lt.u32.totalorder %s890_s12, %s1330_s4 }
  0x2d   : > { %p893_p1 = pnand %p891_p2, %p864_p13 }
  0x2f   : > { %p894_p6 = pneg %p893_p1 }
  0x31   : > { %p899_p3 = pnand %p897_p10, %p894_p6 }
  0x33   : > { %902 = shalt.err (!%p899_p3)
}
  0x34   : > { %s903_s8 = scalar_lea.vmem %s1123_s11, 1024  ;;  %p911_p12 = scmp.lt.s32.totalorder %s1123_s11, %s1123_s11 }
  0x35   : > { %p904_p5 = scmp.ne.s32.totalorder %s1123_s11, %s903_s8  ;;  %p912_p0 = scmp.lt.s32.totalorder %s903_s8, %s903_s8 }
  0x37   : > { %p906_p7 = pnand %p904_p5, %p864_p13  ;;  %p913_p2 = por %p912_p0, %p911_p12 }
  0x39   : > { %p907_p9 = pneg %p906_p7 }
  0x3b   : > { %p914_p1 = pnand %p913_p2, %p907_p9 }
  0x3d   : > { %917 = shalt.err (!%p914_p1)
}
  0x3e   : > { %791 = dma.hbm_to_vmem [thread:$0]  (!%p1119_p11), %s1330_s4, 1024, %s1123_s11, [#allocation7], %s1022_s20, %s1022_s20, %s1023_s21  }
  0x3f   : > { %s1178_s19 = sadd.s32 1, %s1018_s26   ;;  %s52_s9 = sadd.s32 1, %s1014_s25 }
  0x40   : > { %s49_s22 = ssub.s32 %s1018_s26, %s1178_s19  ;;  %p59_p13 = scmp.ne.s32.totalorder %s1014_s25, %s1010_s24 }
  0x41   : > { %p50_p6 = scmp.eq.s32.totalorder %s49_s22, 0  ;;  %p60_p10 = scmp.eq.s32.totalorder %s1018_s26, 0 }
  0x42   : > { %p1340_p3 = scmp.eq.s32.totalorder %s1089_s0, 1  ;;  %p802_p7 = scmp.lt.s32.totalorder %s1018_s26, 2 }
  0x43   : > { %s1194_s7 = scalar_select %p50_p6, %s1014_s25, %s52_s9  }
  0x44   : > { %p1188_p5 = por %p1340_p3, %p59_p13  ;;  %p61_p9 = por %p60_p10, %p59_p13 }
  0x45   : > { %s234_s10 = sand.u32 1, %s1014_s25   ;;  %s711_s11 = sshll.u32 %s1018_s26, 9 }
  0x46   : > { %s1341_s27 = scalar_select %p1188_p5, 1, 0 }
  0x47   : > { %s680_s12 = sshll.u32 %s234_s10, 5  ;;  %s1201_s13 = scalar_lea.hbm %s1327_s1, %s711_s11 }
  0x48   : > { %s238_s14 = scalar_lea.vmem [#allocation3], %s680_s12  ;;  %p1205_p11 = pnand %p802_p7, %p61_p9 }
  0x49   : > { %s245_s15 = sshll.u32 %s238_s14, 4  ;;  %s1209_s8 = scalar_lea.sflag [#allocation4], %s234_s10  ;;  %s1203_s15 = int_to_ptr.vmem [resolvable:$true] %s245_s15 }
  0x4a   : > { %s918_s17 = scalar_lea.hbm %s1201_s13, 512  ;;  %p920_p0 = pneg %p1205_p11 }
  0x4b   : > { %p919_p12 = scmp.ne.s32.totalorder %s1201_s13, %s918_s17  ;;  %s923_s22 = scalar_lea.hbm %s1327_s1, 1024 }
  0x4c   : > { %p924_p13 = scmp.lt.u32.totalorder %s1201_s13, %s1327_s1  ;;  %p925_p6 = scmp.lt.u32.totalorder %s923_s22, %s918_s17 }
  0x4d   : > { %p921_p2 = pnand %p920_p0, %p919_p12  ;;  %p927_p3 = scmp.lt.u32.totalorder %s918_s17, %s1201_s13 }
  0x4e   : > { %p926_p10 = por %p925_p6, %p924_p13 }
  0x4f   : > { %p922_p1 = pneg %p921_p2 }
  0x50   : > { %p928_p7 = por %p927_p3, %p926_p10 }
  0x52   : > { %p929_p9 = pnand %p928_p7, %p922_p1 }
  0x54   : > { %932 = shalt.err (!%p929_p9)
}
  0x55   : > { %s933_s10 = scalar_lea.vmem %s1203_s15, 512  ;;  %s1024_s20 = smov [#allocation3]  }
  0x56   : > { %p934_p12 = scmp.ne.s32.totalorder %s1203_s15, %s933_s10  ;;  %s938_s21 = sshll.u32 %s1024_s20, 4  ;;  %s939_s21 = int_to_ptr.vmem [resolvable:$false] %s938_s21 }
  0x57   : > { %s940_s14 = scalar_lea.vmem %s939_s21, 1024  ;;  %p941_p4 = scmp.lt.s32.totalorder %s1203_s15, %s939_s21 }
  0x58   : > { %p936_p2 = pnand %p934_p12, %p920_p0  ;;  %p942_p13 = scmp.lt.s32.totalorder %s940_s14, %s933_s10 }
  0x5a   : > { %p937_p5 = pneg %p936_p2  ;;  %p943_p6 = por %p942_p13, %p941_p4 }
  0x5c   : > { %p944_p10 = pnand %p943_p6, %p937_p5 }
  0x5e   : > { %947 = shalt.err (!%p944_p10)
}
  0x5f   : > { %s1025_s17 = smov 128   ;;  %s1026_s18 = smov 8  }
  0x60   : > { %795 = dma.hbm_to_vmem [thread:$0]  (!%p1205_p11), %s1201_s13, 512, %s1203_s15, %s1209_s8, %s1025_s17, %s1025_s17, %s1026_s18  }
  0x61   : > { %257 = sbr.rel (%p1108_p8) target bundleno = 599 (0x257), region = 44  ;;  %s1240_s9 = sand.u32 (!%p1108_p8), 1, %s1010_s24  }
  0x62   : > { %s684_s22 = sshll.u32 (!%p1108_p8), %s1240_s9, 5  ;;  %s260_s12 = scalar_lea.sflag (!%p1108_p8), [#allocation4], %s1240_s9 }
  0x63   : > { %s1246_s11 = scalar_lea.vmem (!%p1108_p8), [#allocation3], %s684_s22  ;;  %p1343_p4 = scmp.ne.s32.totalorder (!%p1108_p8), %s1336_s28, 0 }
  0x68   : > { %993 = dma.done.wait (%p1343_p4), %s260_s12, 512  }
  0x69   : > { %995 = vsyncadd (%p1343_p4), %s260_s12, 4294966784  ;;  %p1344_p5 = scmp.eq.s32.totalorder %s1089_s0, 0 }
  0x6b   : > { %997 = dma.done.wait (%p1344_p5), [#allocation7], 2048   ;;  %p1345_p8 = pmov %p1344_p5 }
  0x6c   : > { %v846_v0 = vld [vmem:[#allocation6] sm:$0xff]   ;;  %v847_v1 = vld [vmem:[#allocation6 + $0x8] sm:$0xff]   ;;  %v848_v2 = vld [vmem:[#allocation6 + $0x10] sm:$0xff]   ;;  %s555_s13 = sld [smem:[#allocation2]]  ;;  %s299_s8 = scalar_lea.vmem [#allocation9], %s684_s22 }
  0x6d   : > { %999 = vsyncadd (%p1345_p8), [#allocation7], 4294965248  ;;  %733 = vmatprep.subr.bf16.mxu0 %v846_v0  ;;  %v849_v3 = vld [vmem:[#allocation6 + $0x18] sm:$0xff]   ;;  %v1257_v4 = vld [vmem:[%s1246_s11] sm:$0xff]  ;;  %s583_s10 = sshll.u32 %s299_s8, 4  ;;  %s712_s20 = sshll.u32 %s1089_s0, 9  ;;  %s1275_s10 = int_to_ptr.vmem [resolvable:$true] %s583_s10 }
  0x6e   : > { %734 = vmatpush3.bf16.msra.mxu0 %v846_v0  ;;  %v1260_v5 = vld [vmem:[%s1246_s11 + $0x8] sm:$0xff]  ;;  %v854_v7 = vld [vmem:[#allocation8] sm:$0xff]   ;;  %v856_v10 = vld [vmem:[#allocation8 + $0x10] sm:$0xff]   ;;  %s1281_s17 = scalar_lea.hbm %s1332_s6, %s712_s20  ;;  %s570_s0 = scalar_lea.sflag [#allocation5], %s1240_s9 }
  0x6f   : > { %735 = vmatprep.subr.bf16.mxu0 %v847_v1  ;;  %v307_v6 = vpack.c.bf16 %v1260_v5, %v1257_v4  ;;  %v855_v8 = vld [vmem:[#allocation8 + $0x8] sm:$0xff]   ;;  %v850_v9 = vld [vmem:[#allocation6 + $0x20] sm:$0xff]   ;;  %753 = vmatprep.subr.bf16.mxu1 %v854_v7  ;;  %v857_v12 = vld [vmem:[#allocation8 + $0x18] sm:$0xff]   ;;  %s948_s18 = scalar_lea.vmem %s1275_s10, 512  ;;  %p1346_p0 = scmp.ne.s32.totalorder %s1341_s27, 0 }
  0x70   : > { %754 = vmatpush3.bf16.msra.mxu1 %v854_v7  ;;  %v851_v11 = vld [vmem:[#allocation6 + $0x28] sm:$0xff]   ;;  %v852_v13 = vld [vmem:[#allocation6 + $0x30] sm:$0xff]   ;;  %v858_v14 = vld [vmem:[#allocation8 + $0x20] sm:$0xff]   ;;  %p949_p11 = scmp.ne.s32.totalorder %s1275_s10, %s948_s18  ;;  %s1027_s22 = smov [#allocation9]  }
  0x71   : > { %749 = vmatprep.mubr.bf16.mxu0 %v307_v6  ;;  %755 = vmatprep.subr.bf16.mxu1 %v855_v8  ;;  %v853_v15 = vld [vmem:[#allocation6 + $0x38] sm:$0xff]   ;;  %v859_v16 = vld [vmem:[#allocation8 + $0x28] sm:$0xff]   ;;  %v305_v17 = vld [vmem:[%s1246_s11 + $0x10] sm:$0xff]  ;;  %s952_s12 = sshll.u32 %s1027_s22, 4  ;;  %s953_s12 = int_to_ptr.vmem [resolvable:$false] %s952_s12 }
  0x72   : > { %736 = vmatpush3.bf16.msra.mxu0 %v847_v1  ;;  %v306_v18 = vld [vmem:[%s1246_s11 + $0x18] sm:$0xff]  ;;  %v860_v20 = vld [vmem:[#allocation8 + $0x30] sm:$0xff]   ;;  %v688_v22 = vld [vmem:[%s1329_s3] ss:$0 sm:$0xff]  ;;  %v556_v39 = vstv %s555_s13  ;;  %p950_p1 = pnand %p949_p11, %p1346_p0  ;;  %s954_s11 = scalar_lea.vmem %s953_s12, 1024 }
  0x73   : > { %737 = vmatprep.subr.bf16.mxu0 %v848_v2  ;;  %v308_v19 = vpack.c.bf16 %v306_v18, %v305_v17  ;;  %v861_v21 = vld [vmem:[#allocation8 + $0x38] sm:$0xff]   ;;  %v697_v37 = vld [vmem:[%s1331_s5] ss:$0 sm:$0xff]  ;;  %p955_p7 = scmp.lt.s32.totalorder %s1275_s10, %s953_s12  ;;  %p956_p9 = scmp.lt.s32.totalorder %s954_s11, %s948_s18 }
  0x74   : > { %756 = vmatpush3.bf16.msra.mxu1 %v855_v8  ;;  %p951_p3 = pneg %p950_p1 }
  0x75   : > { %757 = vmatprep.subr.bf16.mxu1 %v856_v10  ;;  %p957_p12 = por %p956_p9, %p955_p7 }
  0x76   : > { %738 = vmatpush3.bf16.msra.mxu0 %v848_v2 }
  0x77   : > { %739 = vmatprep.subr.bf16.mxu0 %v849_v3  ;;  %p958_p2 = pnand %p957_p12, %p951_p3 }
  0x78   : > { %758 = vmatpush3.bf16.msra.mxu1 %v856_v10 }
  0x79   : > { %759 = vmatprep.subr.bf16.mxu1 %v857_v12 }
  0x7a   : > { %740 = vmatpush3.bf16.msra.mxu0 %v849_v3 }
  0x7b   : > { %741 = vmatprep.subr.bf16.mxu0 %v850_v9 }
  0x7c   : > { %760 = vmatpush3.bf16.msra.mxu1 %v857_v12 }
  0x7d   : > { %761 = vmatprep.subr.bf16.mxu1 %v858_v14 }
  0x7e   : > { %742 = vmatpush3.bf16.msra.mxu0 %v850_v9 }
  0x7f   : > { %743 = vmatprep.subr.bf16.mxu0 %v851_v11 }
  0x80   : > { %762 = vmatpush3.bf16.msra.mxu1 %v858_v14 }
  0x81   : > { %763 = vmatprep.subr.bf16.mxu1 %v859_v16 }
  0x82   : > { %744 = vmatpush3.bf16.msra.mxu0 %v851_v11 }
  0x83   : > { %745 = vmatprep.subr.bf16.mxu0 %v852_v13 }
  0x84   : > { %764 = vmatpush3.bf16.msra.mxu1 %v859_v16 }
  0x85   : > { %765 = vmatprep.subr.bf16.mxu1 %v860_v20 }
  0x86   : > { %746 = vmatpush3.bf16.msra.mxu0 %v852_v13 }
  0x87   : > { %747 = vmatprep.subr.bf16.mxu0 %v853_v15 }
  0x88   : > { %766 = vmatpush3.bf16.msra.mxu1 %v860_v20 }
  0x89   : > { %767 = vmatprep.subr.bf16.mxu1 %v861_v21 }
  0x8a   : > { %748 = vmatpush3.bf16.msra.mxu0 %v853_v15 }
  0x8c   : > { %768 = vmatpush3.bf16.msra.mxu1 %v861_v21 }
  0x8d   : > { %750 = vmatmul.mubr.bf16.vlgmr.msra.gmra.mrb[0].mxu0 %v308_v19 }
 0x160   : > { %v751_v23 = vpop.f32.mrb[0].mxu0 }
 0x161   : > { %v423_v24 = vadd.f32 %v751_v23, %v688_v22  ;;  %v414_v25 = vpop.f32.mrb[1].mxu0 }
 0x162   : > { %v415_v26 = vadd.f32 %v688_v22, %v414_v25  ;;  %v752_v27 = vpop.f32.mrb[2].mxu0 }
 0x163   : > { %v426_v28 = vadd.f32 %v752_v27, %v688_v22  ;;  %v417_v29 = vpop.f32.mrb[3].mxu0  ;;  %v431_v31 = vmax.f32 %v423_v24, 0.0 }
 0x164   : > { %v418_v30 = vadd.f32 %v688_v22, %v417_v29  ;;  %v429_v33 = vmax.f32 %v415_v26, 0.0 }
 0x165   : > { %v432_v32 = vmax.f32 %v426_v28, 0.0 }
 0x166   : > { %v430_v34 = vmax.f32 %v418_v30, 0.0 }
 0x167   : > { %v434_v35 = vpack.c.bf16 %v432_v32, %v431_v31 }
 0x168   : > { %v433_v36 = vpack.c.bf16 %v430_v34, %v429_v33 }
 0x16a   : > { %769 = vmatprep.mubr.bf16.mxu1 %v433_v36 }
 0x16b   : > { %770 = vmatmul.mubr.bf16.vlgmr.msra.gmra.mrb[0].mxu1 %v434_v35 }
 0x23e   : > { %v771_v38 = vpop.f32.mrb[0].mxu1 }
 0x23f   : > { %v549_v40 = vadd.f32 %v771_v38, %v697_v37  ;;  %v540_v41 = vpop.f32.mrb[1].mxu1 }
 0x240   : > { %v541_v42 = vadd.f32 %v697_v37, %v540_v41  ;;  %v772_v43 = vpop.f32.mrb[2].mxu1 }
 0x241   : > { %v559_v44 = vmul.f32 %v556_v39, %v549_v40  ;;  %v552_v45 = vadd.f32 %v772_v43, %v697_v37  ;;  %v543_v46 = vpop.f32.mrb[3].mxu1 }
 0x242   : > { %v557_v47 = vmul.f32 %v556_v39, %v541_v42  ;;  %v544_v48 = vadd.f32 %v697_v37, %v543_v46 }
 0x243   : > { %v563_v49 = vadd.f32 %v559_v44, %v305_v17  ;;  %v560_v50 = vmul.f32 %v556_v39, %v552_v45 }
 0x244   : > { %v561_v51 = vadd.f32 %v557_v47, %v1257_v4  ;;  %v558_v52 = vmul.f32 %v556_v39, %v544_v48 }
 0x245   : > { %567 = vst [vmem:[%s299_s8 + $0x10] sm:$0xff] %v563_v49  ;;  %v564_v53 = vadd.f32 %v560_v50, %v306_v18 }
 0x246   : > { %565 = vst [vmem:[%s299_s8] sm:$0xff] %v561_v51  ;;  %v562_v54 = vadd.f32 %v558_v52, %v1260_v5 }
 0x247   : > { %568 = vst [vmem:[%s299_s8 + $0x18] sm:$0xff] %v564_v53 }
 0x248   : > { %566 = vst [vmem:[%s299_s8 + $0x8] sm:$0xff] %v562_v54 }
 0x249   : > { %961 = shalt.err (!%p958_p2)
}
 0x24a   : > { %s962_s28 = scalar_lea.hbm %s1281_s17, 512  ;;  %s966_s15 = scalar_lea.hbm %s1332_s6, 1024 }
 0x24b   : > { %p963_p13 = scmp.ne.s32.totalorder %s1281_s17, %s962_s28  ;;  %p967_p4 = scmp.lt.u32.totalorder %s1281_s17, %s1332_s6 }
 0x24c   : > { %p968_p5 = scmp.lt.u32.totalorder %s966_s15, %s962_s28  ;;  %p970_p11 = scmp.lt.u32.totalorder %s962_s28, %s1281_s17 }
 0x24d   : > { %p964_p6 = pnand %p963_p13, %p1346_p0 }
 0x24e   : > { %p969_p8 = por %p968_p5, %p967_p4 }
 0x24f   : > { %p965_p10 = pneg %p964_p6 }
 0x250   : > { %p971_p1 = por %p970_p11, %p969_p8 }
 0x252   : > { %p972_p3 = pnand %p971_p1, %p965_p10 }
 0x254   : > { %975 = shalt.err (!%p972_p3)
}
 0x255   : > { %s1028_s20 = smov 128   ;;  %s1029_s21 = smov 8  }
 0x256   : > { %783 = dma.vmem_to_hbm [thread:$0]  (%p1346_p0), %s1275_s10, 512, %s1281_s17, %s570_s0, %s1028_s20, %s1028_s20, %s1029_s21  }
 0x257 PF: > { %s598_s14 = sand.u32 1, %s1006_s23   ;;  %p1347_p7 = scmp.ne.s32.totalorder %s1337_s29, 0 }
 0x258   : > { %p1348_p9 = scmp.ge.s32.totalorder %s1018_s26, 2  ;;  %s599_s18 = scalar_lea.sflag [#allocation5], %s598_s14 }
 0x25a   : > { %p797_p12 = pnand %p1348_p9, %p1347_p7 }
 0x25c   : > { %1001 = dma.done.wait (!%p797_p12), %s599_s18, 512  }
 0x25d   : > { %1003 = vsyncadd (!%p797_p12), %s599_s18, 4294966784  ;;  %p21_p2 = scmp.ge.s32.totalorder %s1178_s19, 4   ;;  %s1349_s23 = smov %s1010_s24 }
 0x25e   : > { %s1350_s24 = smov %s1014_s25  ;;  %s1351_s25 = smov %s1194_s7 }
 0x25f   : > { %s1352_s26 = smov %s1178_s19  ;;  %23 = sbr.rel (!%p21_p2) target bundleno = 8 (0x8), region = 97 }
 0x266   :  { %604 = vsyncpa [#allocation4], 1 }
 0x267   :  { %606 = vsyncpa [#allocation4 + $0x1], 1 }
 0x268   :  { %607 = vsyncpa [#allocation7], 1 }
 0x269   :  { %608 = vsyncpa [#allocation5], 1 }
 0x26a   :  { %610 = vsyncpa [#allocation5 + $0x1], 1 }

// kernel: tpu_custom_call.1
= control target key start
LH: loop header
LB: loop body
LE: loop exit
PB: predicated region body
PF: predicated region fallthrough
CT: control target
= control target key end

     0   :  { %s1326_s0 = inlined_call_operand.<no memory space> [shape: f32[1], index: 0, kind: input, shape index: {}]   ;;  %s1327_s1 = inlined_call_operand.hbm [shape: f32[64,128], index: 1, kind: input, shape index: {}]   ;;  %s1328_s2 = inlined_call_operand.hbm [shape: bf16[128,128], index: 2, kind: input, shape index: {}]   ;;  %s1329_s3 = inlined_call_operand.vmem [shape: f32[1,128], index: 3, kind: input, shape index: {}]   ;;  %s1330_s4 = inlined_call_operand.hbm [shape: bf16[128,128], index: 4, kind: input, shape index: {}]   ;;  %s1331_s5 = inlined_call_operand.vmem [shape: f32[1,128], index: 5, kind: input, shape index: {}]   ;;  %s1332_s6 = inlined_call_operand.hbm [shape: f32[64,128], index: 6, kind: output, shape index: {}]  }
   0x1   :  { %11 = sst [smem:[#allocation2]] %s1326_s0 }
   0x2   :  { %12 = vsyncpa [#allocation4], 0 }
   0x3   :  { %14 = vsyncpa [#allocation4 + $0x1], 0 }
   0x4   :  { %15 = vsyncpa [#allocation7], 0 }
   0x5   :  { %16 = vsyncpa [#allocation5], 0 }
   0x6   :  { %18 = vsyncpa [#allocation5 + $0x1], 0  ;;  %s1068_s23 = smov 0   ;;  %s1070_s24 = smov 0  }
   0x7   :  { %s1072_s25 = smov 0   ;;  %s1074_s26 = smov 0  }
   0x8 LB: > { %s1089_s0 = sadd.s32 4294967295, %s1018_s26   ;;  %s675_s27 = sadd.s32 4294967294, %s1018_s26   ;;  %s1018_s26 = sphi %s1074_s26, %s1352_s26   ;;  %s1014_s25 = sphi %s1072_s25, %s1351_s25   ;;  %s1010_s24 = sphi %s1070_s24, %s1350_s24   ;;  %s1006_s23 = sphi %s1068_s23, %s1349_s23  }
   0x9   : > { %p65_p0 = scmp.ne.s32.totalorder %s1010_s24, %s1006_s23  ;;  %p1333_p1 = scmp.eq.s32.totalorder %s1089_s0, 0 }
   0xa   : > { %p179_p3 = scmp.eq.s32.totalorder %s675_s27, 1  ;;  %p676_p5 = scmp.ge.s32.totalorder %s1018_s26, 1 }
   0xb   : > { %p1098_p4 = por %p1333_p1, %p65_p0  ;;  %p186_p7 = scmp.lt.s32.totalorder %s1018_s26, 3 }
   0xc   : > { %p1103_p6 = por %p179_p3, %p65_p0  ;;  %s1020_s7 = smov [#allocation6]  }
   0xd   : > { %s1336_s28 = scalar_select %p1098_p4, 1, 0 }
   0xe   : > { %s1337_s29 = scalar_select %p1103_p6, 1, 0 }
   0xf   : > { %p1108_p8 = pnand %p676_p5, %p186_p7  ;;  %s201_s8 = sshll.u32 %s1020_s7, 4  ;;  %s1112_s8 = int_to_ptr.vmem [resolvable:$true] %s201_s8 }
  0x10   : > { %s1021_s10 = smov [#allocation8]   ;;  %s862_s14 = scalar_lea.hbm %s1328_s2, 1024 }
  0x11   : > { %p785_p9 = pneg %p1108_p8  ;;  %s217_s11 = sshll.u32 %s1021_s10, 4  ;;  %s1123_s11 = int_to_ptr.vmem [resolvable:$true] %s217_s11 }
  0x12   : > { %p863_p12 = scmp.ne.s32.totalorder %s1328_s2, %s862_s14  ;;  %p869_p5 = scmp.lt.u32.totalorder %s862_s14, %s1328_s2 }
  0x13   : > { %p1119_p11 = pnand %p785_p9, %p1333_p1 }
  0x15   : > { %p864_p13 = pneg %p1119_p11 }
  0x17   : > { %p865_p0 = pnand %p864_p13, %p863_p12 }
  0x19   : > { %p866_p3 = pneg %p865_p0 }
  0x1b   : > { %p871_p7 = pnand %p869_p5, %p866_p3 }
  0x1d   : > { %874 = shalt.err (!%p871_p7)
}
  0x1e   : > { %s875_s19 = scalar_lea.vmem %s1112_s8, 1024  ;;  %p883_p2 = scmp.lt.s32.totalorder %s1112_s8, %s1112_s8 }
  0x1f   : > { %p876_p9 = scmp.ne.s32.totalorder %s1112_s8, %s875_s19  ;;  %p884_p12 = scmp.lt.s32.totalorder %s875_s19, %s875_s19 }
  0x21   : > { %p878_p10 = pnand %p876_p9, %p864_p13  ;;  %p885_p0 = por %p884_p12, %p883_p2 }
  0x23   : > { %p879_p1 = pneg %p878_p10 }
  0x25   : > { %p886_p6 = pnand %p885_p0, %p879_p1 }
  0x27   : > { %889 = shalt.err (!%p886_p6)
}
  0x28   : > { %s1022_s20 = smov 64   ;;  %s1023_s21 = smov 4  }
  0x29   : > { %788 = dma.hbm_to_vmem [thread:$0]  (!%p1119_p11), %s1328_s2, 1024, %s1112_s8, [#allocation7], %s1022_s20, %s1022_s20, %s1023_s21  }
  0x2a   : > { %s890_s12 = scalar_lea.hbm %s1330_s4, 1024 }
  0x2b   : > { %p891_p2 = scmp.ne.s32.totalorder %s1330_s4, %s890_s12  ;;  %p897_p10 = scmp.lt.u32.totalorder %s890_s12, %s1330_s4 }
  0x2d   : > { %p893_p1 = pnand %p891_p2, %p864_p13 }
  0x2f   : > { %p894_p6 = pneg %p893_p1 }
  0x31   : > { %p899_p3 = pnand %p897_p10, %p894_p6 }
  0x33   : > { %902 = shalt.err (!%p899_p3)
}
  0x34   : > { %s903_s8 = scalar_lea.vmem %s1123_s11, 1024  ;;  %p911_p12 = scmp.lt.s32.totalorder %s1123_s11, %s1123_s11 }
  0x35   : > { %p904_p5 = scmp.ne.s32.totalorder %s1123_s11, %s903_s8  ;;  %p912_p0 = scmp.lt.s32.totalorder %s903_s8, %s903_s8 }
  0x37   : > { %p906_p7 = pnand %p904_p5, %p864_p13  ;;  %p913_p2 = por %p912_p0, %p911_p12 }
  0x39   : > { %p907_p9 = pneg %p906_p7 }
  0x3b   : > { %p914_p1 = pnand %p913_p2, %p907_p9 }
  0x3d   : > { %917 = shalt.err (!%p914_p1)
}
  0x3e   : > { %791 = dma.hbm_to_vmem [thread:$0]  (!%p1119_p11), %s1330_s4, 1024, %s1123_s11, [#allocation7], %s1022_s20, %s1022_s20, %s1023_s21  }
  0x3f   : > { %s1178_s19 = sadd.s32 1, %s1018_s26   ;;  %s52_s9 = sadd.s32 1, %s1014_s25 }
  0x40   : > { %s49_s22 = ssub.s32 %s1018_s26, %s1178_s19  ;;  %p59_p13 = scmp.ne.s32.totalorder %s1014_s25, %s1010_s24 }
  0x41   : > { %p50_p6 = scmp.eq.s32.totalorder %s49_s22, 0  ;;  %p60_p10 = scmp.eq.s32.totalorder %s1018_s26, 0 }
  0x42   : > { %p1340_p3 = scmp.eq.s32.totalorder %s1089_s0, 1  ;;  %p802_p7 = scmp.lt.s32.totalorder %s1018_s26, 2 }
  0x43   : > { %s1194_s7 = scalar_select %p50_p6, %s1014_s25, %s52_s9  }
  0x44   : > { %p1188_p5 = por %p1340_p3, %p59_p13  ;;  %p61_p9 = por %p60_p10, %p59_p13 }
  0x45   : > { %s234_s10 = sand.u32 1, %s1014_s25   ;;  %s711_s11 = sshll.u32 %s1018_s26, 9 }
  0x46   : > { %s1341_s27 = scalar_select %p1188_p5, 1, 0 }
  0x47   : > { %s680_s12 = sshll.u32 %s234_s10, 5  ;;  %s1201_s13 = scalar_lea.hbm %s1327_s1, %s711_s11 }
  0x48   : > { %s238_s14 = scalar_lea.vmem [#allocation3], %s680_s12  ;;  %p1205_p11 = pnand %p802_p7, %p61_p9 }
  0x49   : > { %s245_s15 = sshll.u32 %s238_s14, 4  ;;  %s1209_s8 = scalar_lea.sflag [#allocation4], %s234_s10  ;;  %s1203_s15 = int_to_ptr.vmem [resolvable:$true] %s245_s15 }
  0x4a   : > { %s918_s17 = scalar_lea.hbm %s1201_s13, 512  ;;  %p920_p0 = pneg %p1205_p11 }
  0x4b   : > { %p919_p12 = scmp.ne.s32.totalorder %s1201_s13, %s918_s17  ;;  %s923_s22 = scalar_lea.hbm %s1327_s1, 1024 }
  0x4c   : > { %p924_p13 = scmp.lt.u32.totalorder %s1201_s13, %s1327_s1  ;;  %p925_p6 = scmp.lt.u32.totalorder %s923_s22, %s918_s17 }
  0x4d   : > { %p921_p2 = pnand %p920_p0, %p919_p12  ;;  %p927_p3 = scmp.lt.u32.totalorder %s918_s17, %s1201_s13 }
  0x4e   : > { %p926_p10 = por %p925_p6, %p924_p13 }
  0x4f   : > { %p922_p1 = pneg %p921_p2 }
  0x50   : > { %p928_p7 = por %p927_p3, %p926_p10 }
  0x52   : > { %p929_p9 = pnand %p928_p7, %p922_p1 }
  0x54   : > { %932 = shalt.err (!%p929_p9)
}
  0x55   : > { %s933_s10 = scalar_lea.vmem %s1203_s15, 512  ;;  %s1024_s20 = smov [#allocation3]  }
  0x56   : > { %p934_p12 = scmp.ne.s32.totalorder %s1203_s15, %s933_s10  ;;  %s938_s21 = sshll.u32 %s1024_s20, 4  ;;  %s939_s21 = int_to_ptr.vmem [resolvable:$false] %s938_s21 }
  0x57   : > { %s940_s14 = scalar_lea.vmem %s939_s21, 1024  ;;  %p941_p4 = scmp.lt.s32.totalorder %s1203_s15, %s939_s21 }
  0x58   : > { %p936_p2 = pnand %p934_p12, %p920_p0  ;;  %p942_p13 = scmp.lt.s32.totalorder %s940_s14, %s933_s10 }
  0x5a   : > { %p937_p5 = pneg %p936_p2  ;;  %p943_p6 = por %p942_p13, %p941_p4 }
  0x5c   : > { %p944_p10 = pnand %p943_p6, %p937_p5 }
  0x5e   : > { %947 = shalt.err (!%p944_p10)
}
  0x5f   : > { %s1025_s17 = smov 128   ;;  %s1026_s18 = smov 8  }
  0x60   : > { %795 = dma.hbm_to_vmem [thread:$0]  (!%p1205_p11), %s1201_s13, 512, %s1203_s15, %s1209_s8, %s1025_s17, %s1025_s17, %s1026_s18  }
  0x61   : > { %257 = sbr.rel (%p1108_p8) target bundleno = 599 (0x257), region = 44  ;;  %s1240_s9 = sand.u32 (!%p1108_p8), 1, %s1010_s24  }
  0x62   : > { %s684_s22 = sshll.u32 (!%p1108_p8), %s1240_s9, 5  ;;  %s260_s12 = scalar_lea.sflag (!%p1108_p8), [#allocation4], %s1240_s9 }
  0x63   : > { %s1246_s11 = scalar_lea.vmem (!%p1108_p8), [#allocation3], %s684_s22  ;;  %p1343_p4 = scmp.ne.s32.totalorder (!%p1108_p8), %s1336_s28, 0 }
  0x68   : > { %993 = dma.done.wait (%p1343_p4), %s260_s12, 512  }
  0x69   : > { %995 = vsyncadd (%p1343_p4), %s260_s12, 4294966784  ;;  %p1344_p5 = scmp.eq.s32.totalorder %s1089_s0, 0 }
  0x6b   : > { %997 = dma.done.wait (%p1344_p5), [#allocation7], 2048   ;;  %p1345_p8 = pmov %p1344_p5 }
  0x6c   : > { %v846_v0 = vld [vmem:[#allocation6] sm:$0xff]   ;;  %v847_v1 = vld [vmem:[#allocation6 + $0x8] sm:$0xff]   ;;  %v848_v2 = vld [vmem:[#allocation6 + $0x10] sm:$0xff]   ;;  %s555_s13 = sld [smem:[#allocation2]]  ;;  %s299_s8 = scalar_lea.vmem [#allocation9], %s684_s22 }
  0x6d   : > { %999 = vsyncadd (%p1345_p8), [#allocation7], 4294965248  ;;  %733 = vmatprep.subr.bf16.mxu0 %v846_v0  ;;  %v849_v3 = vld [vmem:[#allocation6 + $0x18] sm:$0xff]   ;;  %v1257_v4 = vld [vmem:[%s1246_s11] sm:$0xff]  ;;  %s583_s10 = sshll.u32 %s299_s8, 4  ;;  %s712_s20 = sshll.u32 %s1089_s0, 9  ;;  %s1275_s10 = int_to_ptr.vmem [resolvable:$true] %s583_s10 }
  0x6e   : > { %734 = vmatpush3.bf16.msra.mxu0 %v846_v0  ;;  %v1260_v5 = vld [vmem:[%s1246_s11 + $0x8] sm:$0xff]  ;;  %v854_v7 = vld [vmem:[#allocation8] sm:$0xff]   ;;  %v856_v10 = vld [vmem:[#allocation8 + $0x10] sm:$0xff]   ;;  %s1281_s17 = scalar_lea.hbm %s1332_s6, %s712_s20  ;;  %s570_s0 = scalar_lea.sflag [#allocation5], %s1240_s9 }
  0x6f   : > { %735 = vmatprep.subr.bf16.mxu0 %v847_v1  ;;  %v307_v6 = vpack.c.bf16 %v1260_v5, %v1257_v4  ;;  %v855_v8 = vld [vmem:[#allocation8 + $0x8] sm:$0xff]   ;;  %v850_v9 = vld [vmem:[#allocation6 + $0x20] sm:$0xff]   ;;  %753 = vmatprep.subr.bf16.mxu1 %v854_v7  ;;  %v857_v12 = vld [vmem:[#allocation8 + $0x18] sm:$0xff]   ;;  %s948_s18 = scalar_lea.vmem %s1275_s10, 512  ;;  %p1346_p0 = scmp.ne.s32.totalorder %s1341_s27, 0 }
  0x70   : > { %754 = vmatpush3.bf16.msra.mxu1 %v854_v7  ;;  %v851_v11 = vld [vmem:[#allocation6 + $0x28] sm:$0xff]   ;;  %v852_v13 = vld [vmem:[#allocation6 + $0x30] sm:$0xff]   ;;  %v858_v14 = vld [vmem:[#allocation8 + $0x20] sm:$0xff]   ;;  %p949_p11 = scmp.ne.s32.totalorder %s1275_s10, %s948_s18  ;;  %s1027_s22 = smov [#allocation9]  }
  0x71   : > { %749 = vmatprep.mubr.bf16.mxu0 %v307_v6  ;;  %755 = vmatprep.subr.bf16.mxu1 %v855_v8  ;;  %v853_v15 = vld [vmem:[#allocation6 + $0x38] sm:$0xff]   ;;  %v859_v16 = vld [vmem:[#allocation8 + $0x28] sm:$0xff]   ;;  %v305_v17 = vld [vmem:[%s1246_s11 + $0x10] sm:$0xff]  ;;  %s952_s12 = sshll.u32 %s1027_s22, 4  ;;  %s953_s12 = int_to_ptr.vmem [resolvable:$false] %s952_s12 }
  0x72   : > { %736 = vmatpush3.bf16.msra.mxu0 %v847_v1  ;;  %v306_v18 = vld [vmem:[%s1246_s11 + $0x18] sm:$0xff]  ;;  %v860_v20 = vld [vmem:[#allocation8 + $0x30] sm:$0xff]   ;;  %v688_v22 = vld [vmem:[%s1329_s3] ss:$0 sm:$0xff]  ;;  %v556_v39 = vstv %s555_s13  ;;  %p950_p1 = pnand %p949_p11, %p1346_p0  ;;  %s954_s11 = scalar_lea.vmem %s953_s12, 1024 }
  0x73   : > { %737 = vmatprep.subr.bf16.mxu0 %v848_v2  ;;  %v308_v19 = vpack.c.bf16 %v306_v18, %v305_v17  ;;  %v861_v21 = vld [vmem:[#allocation8 + $0x38] sm:$0xff]   ;;  %v697_v37 = vld [vmem:[%s1331_s5] ss:$0 sm:$0xff]  ;;  %p955_p7 = scmp.lt.s32.totalorder %s1275_s10, %s953_s12  ;;  %p956_p9 = scmp.lt.s32.totalorder %s954_s11, %s948_s18 }
  0x74   : > { %756 = vmatpush3.bf16.msra.mxu1 %v855_v8  ;;  %p951_p3 = pneg %p950_p1 }
  0x75   : > { %757 = vmatprep.subr.bf16.mxu1 %v856_v10  ;;  %p957_p12 = por %p956_p9, %p955_p7 }
  0x76   : > { %738 = vmatpush3.bf16.msra.mxu0 %v848_v2 }
  0x77   : > { %739 = vmatprep.subr.bf16.mxu0 %v849_v3  ;;  %p958_p2 = pnand %p957_p12, %p951_p3 }
  0x78   : > { %758 = vmatpush3.bf16.msra.mxu1 %v856_v10 }
  0x79   : > { %759 = vmatprep.subr.bf16.mxu1 %v857_v12 }
  0x7a   : > { %740 = vmatpush3.bf16.msra.mxu0 %v849_v3 }
  0x7b   : > { %741 = vmatprep.subr.bf16.mxu0 %v850_v9 }
  0x7c   : > { %760 = vmatpush3.bf16.msra.mxu1 %v857_v12 }
  0x7d   : > { %761 = vmatprep.subr.bf16.mxu1 %v858_v14 }
  0x7e   : > { %742 = vmatpush3.bf16.msra.mxu0 %v850_v9 }
  0x7f   : > { %743 = vmatprep.subr.bf16.mxu0 %v851_v11 }
  0x80   : > { %762 = vmatpush3.bf16.msra.mxu1 %v858_v14 }
  0x81   : > { %763 = vmatprep.subr.bf16.mxu1 %v859_v16 }
  0x82   : > { %744 = vmatpush3.bf16.msra.mxu0 %v851_v11 }
  0x83   : > { %745 = vmatprep.subr.bf16.mxu0 %v852_v13 }
  0x84   : > { %764 = vmatpush3.bf16.msra.mxu1 %v859_v16 }
  0x85   : > { %765 = vmatprep.subr.bf16.mxu1 %v860_v20 }
  0x86   : > { %746 = vmatpush3.bf16.msra.mxu0 %v852_v13 }
  0x87   : > { %747 = vmatprep.subr.bf16.mxu0 %v853_v15 }
  0x88   : > { %766 = vmatpush3.bf16.msra.mxu1 %v860_v20 }
  0x89   : > { %767 = vmatprep.subr.bf16.mxu1 %v861_v21 }
  0x8a   : > { %748 = vmatpush3.bf16.msra.mxu0 %v853_v15 }
  0x8c   : > { %768 = vmatpush3.bf16.msra.mxu1 %v861_v21 }
  0x8d   : > { %750 = vmatmul.mubr.bf16.vlgmr.msra.gmra.mrb[0].mxu0 %v308_v19 }
 0x160   : > { %v751_v23 = vpop.f32.mrb[0].mxu0 }
 0x161   : > { %v423_v24 = vadd.f32 %v751_v23, %v688_v22  ;;  %v414_v25 = vpop.f32.mrb[1].mxu0 }
 0x162   : > { %v415_v26 = vadd.f32 %v688_v22, %v414_v25  ;;  %v752_v27 = vpop.f32.mrb[2].mxu0 }
 0x163   : > { %v426_v28 = vadd.f32 %v752_v27, %v688_v22  ;;  %v417_v29 = vpop.f32.mrb[3].mxu0  ;;  %v431_v31 = vmax.f32 %v423_v24, 0.0 }
 0x164   : > { %v418_v30 = vadd.f32 %v688_v22, %v417_v29  ;;  %v429_v33 = vmax.f32 %v415_v26, 0.0 }
 0x165   : > { %v432_v32 = vmax.f32 %v426_v28, 0.0 }
 0x166   : > { %v430_v34 = vmax.f32 %v418_v30, 0.0 }
 0x167   : > { %v434_v35 = vpack.c.bf16 %v432_v32, %v431_v31 }
 0x168   : > { %v433_v36 = vpack.c.bf16 %v430_v34, %v429_v33 }
 0x16a   : > { %769 = vmatprep.mubr.bf16.mxu1 %v433_v36 }
 0x16b   : > { %770 = vmatmul.mubr.bf16.vlgmr.msra.gmra.mrb[0].mxu1 %v434_v35 }
 0x23e   : > { %v771_v38 = vpop.f32.mrb[0].mxu1 }
 0x23f   : > { %v549_v40 = vadd.f32 %v771_v38, %v697_v37  ;;  %v540_v41 = vpop.f32.mrb[1].mxu1 }
 0x240   : > { %v541_v42 = vadd.f32 %v697_v37, %v540_v41  ;;  %v772_v43 = vpop.f32.mrb[2].mxu1 }
 0x241   : > { %v559_v44 = vmul.f32 %v556_v39, %v549_v40  ;;  %v552_v45 = vadd.f32 %v772_v43, %v697_v37  ;;  %v543_v46 = vpop.f32.mrb[3].mxu1 }
 0x242   : > { %v557_v47 = vmul.f32 %v556_v39, %v541_v42  ;;  %v544_v48 = vadd.f32 %v697_v37, %v543_v46 }
 0x243   : > { %v563_v49 = vadd.f32 %v559_v44, %v305_v17  ;;  %v560_v50 = vmul.f32 %v556_v39, %v552_v45 }
 0x244   : > { %v561_v51 = vadd.f32 %v557_v47, %v1257_v4  ;;  %v558_v52 = vmul.f32 %v556_v39, %v544_v48 }
 0x245   : > { %567 = vst [vmem:[%s299_s8 + $0x10] sm:$0xff] %v563_v49  ;;  %v564_v53 = vadd.f32 %v560_v50, %v306_v18 }
 0x246   : > { %565 = vst [vmem:[%s299_s8] sm:$0xff] %v561_v51  ;;  %v562_v54 = vadd.f32 %v558_v52, %v1260_v5 }
 0x247   : > { %568 = vst [vmem:[%s299_s8 + $0x18] sm:$0xff] %v564_v53 }
 0x248   : > { %566 = vst [vmem:[%s299_s8 + $0x8] sm:$0xff] %v562_v54 }
 0x249   : > { %961 = shalt.err (!%p958_p2)
}
 0x24a   : > { %s962_s28 = scalar_lea.hbm %s1281_s17, 512  ;;  %s966_s15 = scalar_lea.hbm %s1332_s6, 1024 }
 0x24b   : > { %p963_p13 = scmp.ne.s32.totalorder %s1281_s17, %s962_s28  ;;  %p967_p4 = scmp.lt.u32.totalorder %s1281_s17, %s1332_s6 }
 0x24c   : > { %p968_p5 = scmp.lt.u32.totalorder %s966_s15, %s962_s28  ;;  %p970_p11 = scmp.lt.u32.totalorder %s962_s28, %s1281_s17 }
 0x24d   : > { %p964_p6 = pnand %p963_p13, %p1346_p0 }
 0x24e   : > { %p969_p8 = por %p968_p5, %p967_p4 }
 0x24f   : > { %p965_p10 = pneg %p964_p6 }
 0x250   : > { %p971_p1 = por %p970_p11, %p969_p8 }
 0x252   : > { %p972_p3 = pnand %p971_p1, %p965_p10 }
 0x254   : > { %975 = shalt.err (!%p972_p3)
}
 0x255   : > { %s1028_s20 = smov 128   ;;  %s1029_s21 = smov 8  }
 0x256   : > { %783 = dma.vmem_to_hbm [thread:$0]  (%p1346_p0), %s1275_s10, 512, %s1281_s17, %s570_s0, %s1028_s20, %s1028_s20, %s1029_s21  }
 0x257 PF: > { %s598_s14 = sand.u32 1, %s1006_s23   ;;  %p1347_p7 = scmp.ne.s32.totalorder %s1337_s29, 0 }
 0x258   : > { %p1348_p9 = scmp.ge.s32.totalorder %s1018_s26, 2  ;;  %s599_s18 = scalar_lea.sflag [#allocation5], %s598_s14 }
 0x25a   : > { %p797_p12 = pnand %p1348_p9, %p1347_p7 }
 0x25c   : > { %1001 = dma.done.wait (!%p797_p12), %s599_s18, 512  }
 0x25d   : > { %1003 = vsyncadd (!%p797_p12), %s599_s18, 4294966784  ;;  %p21_p2 = scmp.ge.s32.totalorder %s1178_s19, 4   ;;  %s1349_s23 = smov %s1010_s24 }
 0x25e   : > { %s1350_s24 = smov %s1014_s25  ;;  %s1351_s25 = smov %s1194_s7 }
 0x25f   : > { %s1352_s26 = smov %s1178_s19  ;;  %23 = sbr.rel (!%p21_p2) target bundleno = 8 (0x8), region = 97 }
 0x266   :  { %604 = vsyncpa [#allocation4], 1 }
 0x267   :  { %606 = vsyncpa [#allocation4 + $0x1], 1 }
 0x268   :  { %607 = vsyncpa [#allocation7], 1 }
 0x269   :  { %608 = vsyncpa [#allocation5], 1 }
 0x26a   :  { %610 = vsyncpa [#allocation5 + $0x1], 1 }

</bundles_post_ra>
